<compile_context>
chip_gen: v5e
topology: v5e:2x2
jax: 0.10.0
libtpu: 0.0.40
codegen_flags: <defaults>
</compile_context>

<pallas_src>
import numpy as np
import jax
import jax.numpy as jnp
from jax.experimental import pallas as pl
from jax.experimental.pallas import tpu as pltpu


def make_l2pool_filter(filter_size=5):
    # Mirrors the PyTorch __init__: hanning(5)[1:-1] outer product, normalized.
    a = np.hanning(filter_size)[1:-1]
    g = a[:, None] * a[None, :]
    return (g / g.sum()).astype(np.float32)  # (3, 3); identical for every channel


def _sep_taps(filter_size=5):
    # The normalized 3x3 Hanning^2 filter separates: g = w (outer) w with
    # w = hanning(5)[1:-1] / sum = [0.25, 0.5, 0.25] (symmetric).
    a = np.hanning(filter_size)[1:-1]
    w = a / a.sum()
    assert w.shape == (3,) and abs(w[0] - w[2]) < 1e-12
    return float(w[0]), float(w[1])  # (edge, center)


def _vmem_limit_bytes():
    cap = 64 * 1024 * 1024  # conservative fallback (safe on every generation)
    try:
        cap = int(pltpu.get_tpu_info().vmem_capacity_bytes)
    except Exception:
        pass
    # Leave headroom for compiler-internal scratch; cap large parts at ~96 MiB.
    return int(min(cap * 3 // 4, 96 * 1024 * 1024))


def _choose_channel_tile(c, ho, wo, itemsize, n, budget_bytes):
    """Channel tile (multiple of 128 lanes) for the channels-on-lanes path."""
    per_ch = (
        2 * 2 * (ho + 1) * (2 * wo + 1) * itemsize  # double-buffered xe+xo blocks
        + 2 * ho * wo * itemsize                    # double-buffered output block
        + 4 * (ho + 1) * (wo + 1) * 4               # in-kernel f32 temporaries
    )
    c128 = -(-c // 128) * 128
    ct = max(128, (budget_bytes // per_ch) // 128 * 128)
    ct = min(ct, c128)
    # TODO(synk): for very large Ho*Wo add an H row-tile grid axis (1-row halo)
    # instead of squeezing the channel tile below 128 lanes.
    if n == 1 and ct == c128 and c128 >= 256:
        # v7x has 2 TensorCores: make sure the grid has >= 2 parallel steps.
        ct = -(-(c128 // 2) // 128) * 128
    c_pad = -(-c // ct) * ct
    return ct, c_pad


def _make_kernel(we, wm, col_shift):
    """Separable 3x3 Hanning^2 pooling of squared inputs, stride 2.

    xe_ref: even-column phase, (Ho+1, 2, We, [Ct]) -- the size-2 dim interleaves
            even/odd padded rows.  xo_ref: odd-column phase (We - col_shift wide).
    o_ref : (Ho, Wout, [Ct]).  col_shift = 1 for channels-on-lanes blocks
            (W on sublanes), = C for lane-folded blocks (W*C on lanes).
    """

    def kernel(xe_ref, xo_ref, o_ref):
        ho = o_ref.shape[0]
        wout = o_ref.shape[1]

        def row_pass(ref):
            # 3x1 row conv at stride 2: row parity lives on leading dims, so the
            # taps are plain leading-dim slices (no lane/sublane shifts).
            ev = ref[:, 0].astype(jnp.float32)      # padded rows 0, 2, ..., 2*Ho
            ev = ev * ev
            od = ref[0:ho, 1].astype(jnp.float32)   # padded rows 1, 3, ..., 2*Ho-1
            od = od * od
            return we * (ev[0:ho] + ev[1:ho + 1]) + wm * od

        re = row_pass(xe_ref)   # (Ho, Wout + col_shift, [Ct])  even columns
        ro = row_pass(xo_ref)   # (Ho, Wout,             [Ct])  odd columns
        # 1x3 column conv at stride 2: the only shifted (tile-crossing) slice.
        acc = we * (re[:, 0:wout] + re[:, col_shift:wout + col_shift]) + wm * ro
        o_ref[...] = jnp.sqrt(acc + 1e-12).astype(o_ref.dtype)

    return kernel


def l2pooling_nhwc(x, filter_size=5, stride=2):
    """L2pooling on an NHWC tensor, returns NHWC. Fast entry point: no layout
    transposes; the only HBM glue is one fused pad + column-parity split."""
    assert filter_size == 5 and stride == 2, "specialized to default L2pooling config"
    padding = (filter_size - 2) // 2            # 1
    k = filter_size - 2                         # 3 taps per axis
    n, h, w, c = x.shape
    ho = (h + 2 * padding - k) // stride + 1
    wo = (w + 2 * padding - k) // stride + 1
    we, wm = _sep_taps(filter_size)

    hp = 2 * (ho + 1)        # padded rows 0 .. 2*Ho (+1 spare, never read)
    wp = 2 * wo + 1          # padded cols 0 .. 2*Wo
    vmem_limit = _vmem_limit_bytes()
    itemsize = x.dtype.itemsize

    if c >= 128:
        # -------- channels-on-lanes path (lane-dense output stores) --------
        ct, c_pad = _choose_channel_tile(c, ho, wo, itemsize, n,
                                         budget_bytes=vmem_limit * 4 // 5)
        xpad = jnp.pad(x, ((0, 0),
                           (padding, hp - h - padding),
                           (padding, wp - w - padding),
                           (0, c_pad - c)))
        # Column-parity split (glue); row-parity split is a free reshape.
        xe = xpad[:, :, 0::2, :].reshape(n, ho + 1, 2, wo + 1, c_pad)
        xo = xpad[:, :, 1::2, :].reshape(n, ho + 1, 2, wo, c_pad)
        out = pl.pallas_call(
            _make_kernel(we, wm, col_shift=1),
            out_shape=jax.ShapeDtypeStruct((n, ho, wo, c_pad), x.dtype),
            grid=(n, c_pad // ct),
            in_specs=[
                pl.BlockSpec((None, ho + 1, 2, wo + 1, ct),
                             lambda b, cb: (b, 0, 0, 0, cb)),
                pl.BlockSpec((None, ho + 1, 2, wo, ct),
                             lambda b, cb: (b, 0, 0, 0, cb)),
            ],
            out_specs=pl.BlockSpec((None, ho, wo, ct),
                                   lambda b, cb: (b, 0, 0, cb)),
            compiler_params=pltpu.CompilerParams(
                dimension_semantics=("parallel", "parallel"),
                vmem_limit_bytes=vmem_limit),
        )(xe, xo)
        return out[..., :c] if c_pad != c else out

    # -------- small-C fallback: fold the parity-split W dim into lanes --------
    xpad = jnp.pad(x, ((0, 0),
                       (padding, hp - h - padding),
                       (padding, wp - w - padding),
                       (0, 0)))
    xe = xpad[:, :, 0::2, :].reshape(n, ho + 1, 2, (wo + 1) * c)
    xo = xpad[:, :, 1::2, :].reshape(n, ho + 1, 2, wo * c)
    # TODO(synk): add an H row-tile grid axis (1-row halo) for very large
    # Ho*Wo*C blocks and for N==1 on v7x (second TensorCore currently idle).
    out = pl.pallas_call(
        _make_kernel(we, wm, col_shift=c),
        out_shape=jax.ShapeDtypeStruct((n, ho, wo * c), x.dtype),
        grid=(n,),
        in_specs=[
            pl.BlockSpec((None, ho + 1, 2, (wo + 1) * c), lambda b: (b, 0, 0, 0)),
            pl.BlockSpec((None, ho + 1, 2, wo * c), lambda b: (b, 0, 0, 0)),
        ],
        out_specs=pl.BlockSpec((None, ho, wo * c), lambda b: (b, 0, 0)),
        compiler_params=pltpu.CompilerParams(
            dimension_semantics=("parallel",),
            vmem_limit_bytes=vmem_limit),
    )(xe, xo)
    return out.reshape(n, ho, wo, c)


def l2pooling(x, filter_size=5, stride=2):
    # NCHW drop-in for the PyTorch module.  NOTE: the two transposes below are
    # pure HBM glue -- channels-last pipelines should call l2pooling_nhwc.
    y = l2pooling_nhwc(jnp.transpose(x, (0, 2, 3, 1)), filter_size, stride)
    return jnp.transpose(y, (0, 3, 1, 2))


def l2pooling_ref(x, filter_size=5, stride=2):
    # Pure-JAX reference of the PyTorch forward (grouped depthwise conv).
    padding = (filter_size - 2) // 2
    c = x.shape[1]
    filt = jnp.asarray(make_l2pool_filter(filter_size))
    wgt = jnp.broadcast_to(filt[None, None],
                           (c, 1, filter_size - 2, filter_size - 2))
    y = jax.lax.conv_general_dilated(
        x * x, wgt,
        window_strides=(stride, stride),
        padding=((padding, padding), (padding, padding)),
        dimension_numbers=("NCHW", "OIHW", "NCHW"),
        feature_group_count=c)
    return jnp.sqrt(y + 1e-12)


if __name__ == "__main__":
    k1, k2, k3 = jax.random.split(jax.random.PRNGKey(0), 3)

    def _check(x, tag):
        out = jax.block_until_ready(l2pooling(x))
        ref = jax.block_until_ready(l2pooling_ref(x))
        assert out.shape == ref.shape, (tag, out.shape, ref.shape)
        assert np.allclose(np.asarray(out), np.asarray(ref),
                           atol=1e-5, rtol=1e-5), tag
        return out

    # Module-default demo shape (NCHW): small C -> lane-folded path.
    out = _check(jax.random.normal(k1, (2, 4, 16, 16), jnp.float32), "small_c")
    assert out.shape == (2, 4, 8, 8), out.shape

    # Channels-on-lanes path with channel tiling (C >= 128, N == 1 -> 2 tiles).
    _check(jax.random.normal(k2, (1, 256, 16, 16), jnp.float32), "lane_dense")

    # Odd spatial extents (exercises the padding geometry).
    _check(jax.random.normal(k3, (2, 4, 15, 17), jnp.float32), "odd_hw")

    print("KERNEL_OK")
</pallas_src>

<mosaic_0001>
module attributes {stable_mosaic.version = 11 : i64} {
  func.func @kernel(%arg0: i32, %arg1: memref<1x9x2x36xf32, #tpu.memory_space<vmem>>, %arg2: memref<1x9x2x32xf32, #tpu.memory_space<vmem>>, %arg3: memref<1x8x32xf32, #tpu.memory_space<vmem>>) attributes {dimension_semantics = [#tpu.dimension_semantics<parallel>], iteration_bounds = array<i64: 2>, scalar_prefetch = 0 : i64, scratch_operands = 0 : i64, tpu.core_type = #tpu.core_type<tc>, window_params = [{transform_indices = @transform_0, window_bounds = array<i64: 1, 9, 2, 36>}, {transform_indices = @transform_1, window_bounds = array<i64: 1, 9, 2, 32>}, {transform_indices = @transform_2, window_bounds = array<i64: 1, 8, 32>}]} {
    %c0 = arith.constant 0 : index
    %c0_0 = arith.constant 0 : index
    %c0_1 = arith.constant 0 : index
    %c0_2 = arith.constant 0 : index
    %0 = vector.load %arg1[%c0, %c0_0, %c0_1, %c0_2] : memref<1x9x2x36xf32, #tpu.memory_space<vmem>>, vector<1x9x1x36xf32>
    %1 = vector.shape_cast %0 : vector<1x9x1x36xf32> to vector<9x36xf32>
    %2 = arith.mulf %1, %1 : vector<9x36xf32>
    %c0_3 = arith.constant 0 : index
    %c0_4 = arith.constant 0 : index
    %c1 = arith.constant 1 : index
    %c0_5 = arith.constant 0 : index
    %3 = vector.load %arg1[%c0_3, %c0_4, %c1, %c0_5] : memref<1x9x2x36xf32, #tpu.memory_space<vmem>>, vector<1x8x1x36xf32>
    %4 = vector.shape_cast %3 : vector<1x8x1x36xf32> to vector<8x36xf32>
    %5 = arith.mulf %4, %4 : vector<8x36xf32>
    %6 = vector.extract_strided_slice %2 {offsets = [0, 0], sizes = [8, 36], strides = [1, 1]} : vector<9x36xf32> to vector<8x36xf32>
    %7 = vector.extract_strided_slice %2 {offsets = [1, 0], sizes = [8, 36], strides = [1, 1]} : vector<9x36xf32> to vector<8x36xf32>
    %8 = arith.addf %6, %7 : vector<8x36xf32>
    %cst = arith.constant 2.500000e-01 : f32
    %9 = vector.broadcast %cst : f32 to vector<8x36xf32>
    %10 = arith.mulf %9, %8 : vector<8x36xf32>
    %cst_6 = arith.constant 5.000000e-01 : f32
    %11 = vector.broadcast %cst_6 : f32 to vector<8x36xf32>
    %12 = arith.mulf %11, %5 : vector<8x36xf32>
    %13 = arith.addf %10, %12 : vector<8x36xf32>
    %c0_7 = arith.constant 0 : index
    %c0_8 = arith.constant 0 : index
    %c0_9 = arith.constant 0 : index
    %c0_10 = arith.constant 0 : index
    %14 = vector.load %arg2[%c0_7, %c0_8, %c0_9, %c0_10] : memref<1x9x2x32xf32, #tpu.memory_space<vmem>>, vector<1x9x1x32xf32>
    %15 = vector.shape_cast %14 : vector<1x9x1x32xf32> to vector<9x32xf32>
    %16 = arith.mulf %15, %15 : vector<9x32xf32>
    %c0_11 = arith.constant 0 : index
    %c0_12 = arith.constant 0 : index
    %c1_13 = arith.constant 1 : index
    %c0_14 = arith.constant 0 : index
    %17 = vector.load %arg2[%c0_11, %c0_12, %c1_13, %c0_14] : memref<1x9x2x32xf32, #tpu.memory_space<vmem>>, vector<1x8x1x32xf32>
    %18 = vector.shape_cast %17 : vector<1x8x1x32xf32> to vector<8x32xf32>
    %19 = arith.mulf %18, %18 : vector<8x32xf32>
    %20 = vector.extract_strided_slice %16 {offsets = [0, 0], sizes = [8, 32], strides = [1, 1]} : vector<9x32xf32> to vector<8x32xf32>
    %21 = vector.extract_strided_slice %16 {offsets = [1, 0], sizes = [8, 32], strides = [1, 1]} : vector<9x32xf32> to vector<8x32xf32>
    %22 = arith.addf %20, %21 : vector<8x32xf32>
    %cst_15 = arith.constant 2.500000e-01 : f32
    %23 = vector.broadcast %cst_15 : f32 to vector<8x32xf32>
    %24 = arith.mulf %23, %22 : vector<8x32xf32>
    %cst_16 = arith.constant 5.000000e-01 : f32
    %25 = vector.broadcast %cst_16 : f32 to vector<8x32xf32>
    %26 = arith.mulf %25, %19 : vector<8x32xf32>
    %27 = arith.addf %24, %26 : vector<8x32xf32>
    %28 = vector.extract_strided_slice %13 {offsets = [0, 0], sizes = [8, 32], strides = [1, 1]} : vector<8x36xf32> to vector<8x32xf32>
    %29 = vector.extract_strided_slice %13 {offsets = [0, 4], sizes = [8, 32], strides = [1, 1]} : vector<8x36xf32> to vector<8x32xf32>
    %30 = arith.addf %28, %29 : vector<8x32xf32>
    %cst_17 = arith.constant 2.500000e-01 : f32
    %31 = vector.broadcast %cst_17 : f32 to vector<8x32xf32>
    %32 = arith.mulf %31, %30 : vector<8x32xf32>
    %cst_18 = arith.constant 5.000000e-01 : f32
    %33 = vector.broadcast %cst_18 : f32 to vector<8x32xf32>
    %34 = arith.mulf %33, %27 : vector<8x32xf32>
    %35 = arith.addf %32, %34 : vector<8x32xf32>
    %cst_19 = arith.constant 9.99999996E-13 : f32
    %36 = vector.broadcast %cst_19 : f32 to vector<8x32xf32>
    %37 = arith.addf %35, %36 : vector<8x32xf32>
    %38 = math.sqrt %37 : vector<8x32xf32>
    %c0_20 = arith.constant 0 : index
    %c0_21 = arith.constant 0 : index
    %c0_22 = arith.constant 0 : index
    %39 = vector.load %arg3[%c0_20, %c0_21, %c0_22] : memref<1x8x32xf32, #tpu.memory_space<vmem>>, vector<1x8x32xf32>
    %40 = vector.shape_cast %39 : vector<1x8x32xf32> to vector<8x32xf32>
    %41 = vector.shape_cast %38 : vector<8x32xf32> to vector<1x8x32xf32>
    tpu.vector_store %arg3[%c0_20, %c0_21, %c0_22], %41 {strides = array<i32>} : memref<1x8x32xf32, #tpu.memory_space<vmem>>, vector<1x8x32xf32>,
    return
  }
  func.func @transform_0(%arg0: i32) -> (i32, i32, i32, i32) {
    %c0_i32 = arith.constant 0 : i32
    %c0_i32_0 = arith.constant 0 : i32
    %c0_i32_1 = arith.constant 0 : i32
    %c0_i32_2 = arith.constant 0 : i32
    return %arg0, %c0_i32, %c0_i32_0, %c0_i32_1 : i32, i32, i32, i32
  }
  func.func @transform_1(%arg0: i32) -> (i32, i32, i32, i32) {
    %c0_i32 = arith.constant 0 : i32
    %c0_i32_0 = arith.constant 0 : i32
    %c0_i32_1 = arith.constant 0 : i32
    %c0_i32_2 = arith.constant 0 : i32
    return %arg0, %c0_i32, %c0_i32_0, %c0_i32_1 : i32, i32, i32, i32
  }
  func.func @transform_2(%arg0: i32) -> (i32, i32, i32) {
    %c0_i32 = arith.constant 0 : i32
    %c0_i32_0 = arith.constant 0 : i32
    %c0_i32_1 = arith.constant 0 : i32
    return %arg0, %c0_i32, %c0_i32_0 : i32, i32, i32
  }
}

</mosaic_0001>

<bundles_post_ra>
// kernel: tpu_custom_call.1
= control target key start
LH: loop header
LB: loop body
LE: loop exit
PB: predicated region body
PF: predicated region fallthrough
CT: control target
= control target key end

     0   :  { %7 = vsyncpa [#allocation3], 0  ;;  %s1215_s0 = inlined_call_operand.hbm [shape: f32[2,9,2,36], index: 0, kind: input, shape index: {}]   ;;  %s1216_s1 = inlined_call_operand.hbm [shape: f32[2,9,2,32], index: 1, kind: input, shape index: {}]   ;;  %s1217_s2 = inlined_call_operand.hbm [shape: f32[2,8,32], index: 2, kind: output, shape index: {}]  }
   0x1   :  { %9 = vsyncpa [#allocation3 + $0x1], 0 }
   0x2   :  { %10 = vsyncpa [#allocation6], 0 }
   0x3   :  { %12 = vsyncpa [#allocation6 + $0x1], 0 }
   0x4   :  { %13 = vsyncpa [#allocation4], 0 }
   0x5   :  { %15 = vsyncpa [#allocation4 + $0x1], 0  ;;  %s883_s9 = smov 0   ;;  %s885_s10 = smov 0  }
   0x6   :  { %s887_s11 = smov 0   ;;  %s889_s12 = smov 0  }
   0x7 LB: > { %s904_s13 = sadd.s32 4294967295, %s863_s12   ;;  %s647_s14 = sadd.s32 4294967294, %s863_s12   ;;  %s863_s12 = sphi %s889_s12, %s1226_s12   ;;  %s859_s11 = sphi %s887_s11, %s1225_s11   ;;  %s855_s10 = sphi %s885_s10, %s1224_s10   ;;  %s851_s9 = sphi %s883_s9, %s1223_s9  }
   0x8   : > { %s908_s15 = sadd.s32 1, %s863_s12   ;;  %s28_s16 = sadd.s32 1, %s859_s11 }
   0x9   : > { %s25_s17 = ssub.s32 %s863_s12, %s908_s15  ;;  %p35_p0 = scmp.ne.s32.totalorder %s859_s11, %s855_s10 }
   0xa   : > { %p26_p1 = scmp.eq.s32.totalorder %s25_s17, 0  ;;  %p36_p2 = scmp.eq.s32.totalorder %s863_s12, 0 }
   0xb   : > { %p41_p3 = scmp.ne.s32.totalorder %s855_s10, %s851_s9  ;;  %p42_p4 = scmp.eq.s32.totalorder %s904_s13, 0 }
   0xc   : > { %s920_s18 = scalar_select %p26_p1, %s859_s11, %s28_s16  }
   0xd   : > { %p37_p5 = por %p36_p2, %p35_p0  ;;  %p922_p6 = por %p42_p4, %p41_p3 }
   0xe   : > { %p91_p7 = scmp.eq.s32.totalorder %s904_s13, 1  ;;  %p97_p8 = scmp.eq.s32.totalorder %s647_s14, 1 }
   0xf   : > { %p649_p9 = scmp.ge.s32.totalorder %s863_s12, 2  ;;  %p680_p10 = scmp.lt.s32.totalorder %s863_s12, 2 }
  0x10   : > { %p929_p11 = por %p91_p7, %p35_p0  ;;  %p933_p12 = por %p97_p8, %p41_p3 }
  0x11   : > { %s938_s22 = sand.u32 1, %s859_s11   ;;  %s659_s23 = smul.u32 18, %s863_s12 }
  0x12   : > { %s658_s24 = smul.u32 18, %s938_s22  ;;  %p947_p13 = pnand %p680_p10, %p37_p5 }
  0x13   : > { %s126_s27 = scalar_lea.hbm %s1215_s0, %s659_s23  ;;  %s118_s4 = scalar_lea.sflag [#allocation3], %s938_s22 }
  0x14   : > { %s127_s29 = sshll.u32 %s126_s27, 4  ;;  %s121_s30 = scalar_lea.vmem [#allocation2], %s658_s24  ;;  %s128_s29 = int_to_ptr.hbm [resolvable:$true] %s127_s29 }
  0x15   : > { %s129_s3 = sshll.u32 %s121_s30, 4  ;;  %s733_s5 = sshra.s32 %s128_s29, 4  ;;  %s130_s3 = int_to_ptr.vmem [resolvable:$true] %s129_s3  ;;  %s734_s5 = int_to_ptr.hbm [resolvable:$true] %s733_s5 }
  0x16   : > { %s735_s6 = scalar_lea.hbm %s734_s5, 18  ;;  %p737_p1 = pneg %p947_p13 }
  0x17   : > { %p736_p0 = scmp.ne.s32.totalorder %s734_s5, %s735_s6  ;;  %s740_s14 = scalar_lea.hbm %s1215_s0, 36 }
  0x18   : > { %p741_p4 = scmp.lt.s32.totalorder %s734_s5, %s1215_s0  ;;  %p742_p5 = scmp.lt.s32.totalorder %s740_s14, %s735_s6 }
  0x19   : > { %p738_p2 = pnand %p737_p1, %p736_p0 }
  0x1a   : > { %p743_p7 = por %p742_p5, %p741_p4 }
  0x1b   : > { %p739_p3 = pneg %p738_p2 }
  0x1d   : > { %p744_p8 = pnand %p743_p7, %p739_p3 }
  0x1f   : > { %747 = shalt.err (!%p744_p8)
}
  0x20   : > { %s865_s25 = smov 32   ;;  %s866_s26 = smov 2  }
  0x21   : > { %672 = dma.hbm_to_vmem [thread:$0]  (!%p947_p13), %s128_s29, 288, %s130_s3, %s118_s4, %s865_s25, %s865_s25, %s866_s26  }
  0x22   : > { %p652_p10 = scmp.ge.s32.totalorder %s863_s12, 1  ;;  %p159_p0 = scmp.lt.s32.totalorder %s863_s12, 3 }
  0x23   : > { %s148_s6 = scalar_lea.hbm %s1216_s1, %s659_s23  ;;  %s143_s8 = scalar_lea.vmem [#allocation5], %s658_s24 }
  0x24   : > { %p969_p2 = pnand %p652_p10, %p159_p0  ;;  %s149_s7 = sshll.u32 %s148_s6, 4  ;;  %s150_s7 = int_to_ptr.hbm [resolvable:$true] %s149_s7 }
  0x25   : > { %s151_s14 = sshll.u32 %s143_s8, 4  ;;  %s140_s16 = scalar_lea.sflag [#allocation6], %s938_s22  ;;  %s152_s14 = int_to_ptr.vmem [resolvable:$true] %s151_s14 }
  0x26   : > { %s763_s17 = sshra.s32 %s150_s7, 4  ;;  %s770_s30 = scalar_lea.hbm %s1216_s1, 36  ;;  %s764_s17 = int_to_ptr.hbm [resolvable:$true] %s763_s17 }
  0x27   : > { %s765_s29 = scalar_lea.hbm %s764_s17, 18  ;;  %p771_p7 = scmp.lt.s32.totalorder %s764_s17, %s1216_s1 }
  0x28   : > { %p766_p3 = scmp.ne.s32.totalorder %s764_s17, %s765_s29  ;;  %p772_p8 = scmp.lt.s32.totalorder %s770_s30, %s765_s29 }
  0x2a   : > { %p768_p4 = pnand %p766_p3, %p737_p1  ;;  %p773_p10 = por %p772_p8, %p771_p7 }
  0x2c   : > { %p769_p5 = pneg %p768_p4 }
  0x2e   : > { %p774_p0 = pnand %p773_p10, %p769_p5 }
  0x30   : > { %777 = shalt.err (!%p774_p0)
}
  0x31   : > { %675 = dma.hbm_to_vmem [thread:$0]  (!%p947_p13), %s150_s7, 288, %s152_s14, %s140_s16, %s865_s25, %s865_s25, %s866_s26  }
  0x32   : > { %163 = sbr.rel (%p969_p2) target bundleno = 234 (0xea), region = 28  ;;  %s995_s22 = sand.u32 (!%p969_p2), 1, %s855_s10  }
  0x33   : > { %s662_s24 = smul.u32 (!%p969_p2), 18, %s995_s22  ;;  %s166_s6 = scalar_lea.sflag (!%p969_p2), [#allocation3], %s995_s22 }
  0x35   : > { %s999_s8 = scalar_lea.vmem (!%p969_p2), [#allocation2], %s662_s24 }
  0x37   : > { %838 = dma.done.wait (%p922_p6), %s166_s6, 288  }
  0x38   : > { %840 = vsyncadd (%p922_p6), %s166_s6, 4294967008  ;;  %s176_s28 = scalar_lea.sflag [#allocation6], %s995_s22  ;;  %s1006_s25 = scalar_lea.vmem [#allocation5], %s662_s24 }
  0x39   : > { %842 = dma.done.wait (%p922_p6), %s176_s28, 288  }
  0x3a   : > { %844 = vsyncadd (%p922_p6), %s176_s28, 4294967008  ;;  %v207_v0 = vld [vmem:[%s999_s8 + $0x2] sm:$0x1]  ;;  %v208_v1 = vld [vmem:[%s999_s8 + $0x4] sm:$0x1]  ;;  %s867_s19 = smov 124  }
  0x3b   : > { %v225_v2 = vld [vmem:[%s999_s8 + $0x3] sm:$0x1]  ;;  %v216_v3 = vmul.f32 %v207_v0, %v207_v0  ;;  %v217_v4 = vmul.f32 %v208_v1, %v208_v1  ;;  %v206_v6 = vld [vmem:[%s999_s8] sm:$0x1]  ;;  %v224_v7 = vld [vmem:[%s999_s8 + $0x1] sm:$0x1] }
  0x3c   : > { %v233_v5 = vmul.f32 %v225_v2, %v225_v2  ;;  %v209_v8 = vld [vmem:[%s999_s8 + $0x6] sm:$0x1]  ;;  %v215_v9 = vmul.f32 %v206_v6, %v206_v6  ;;  %v232_v10 = vmul.f32 %v224_v7, %v224_v7  ;;  %v226_v12 = vld [vmem:[%s999_s8 + $0x5] sm:$0x1]  ;;  %v210_v13 = vld [vmem:[%s999_s8 + $0x8] sm:$0x1] }
  0x3d   : > { %v218_v11 = vmul.f32 %v209_v8, %v209_v8  ;;  %v227_v14 = vld [vmem:[%s999_s8 + $0x7] sm:$0x1]  ;;  %v241_v15 = vadd.f32 %v217_v4, %v216_v3  ;;  %v234_v17 = vmul.f32 %v226_v12, %v226_v12  ;;  %v219_v18 = vmul.f32 %v210_v13, %v210_v13  ;;  %v211_v19 = vld [vmem:[%s999_s8 + $0xa] sm:$0x1]  ;;  %v228_v20 = vld [vmem:[%s999_s8 + $0x9] sm:$0x1] }
  0x3e   : > { %v257_v16 = vmul.f32 0.5, %v233_v5  ;;  %v240_v21 = vadd.f32 %v216_v3, %v215_v9  ;;  %v256_v22 = vmul.f32 0.5, %v232_v10  ;;  %v235_v25 = vmul.f32 %v227_v14, %v227_v14  ;;  %v212_v27 = vld [vmem:[%s999_s8 + $0xc] sm:$0x1]  ;;  %v213_v31 = vld [vmem:[%s999_s8 + $0xe] sm:$0x1] }
  0x3f   : > { %v242_v23 = vadd.f32 %v218_v11, %v217_v4  ;;  %v249_v24 = vmul.f32 0.25, %v241_v15  ;;  %v220_v26 = vmul.f32 %v211_v19, %v211_v19  ;;  %v243_v29 = vadd.f32 %v219_v18, %v218_v11  ;;  %v214_v35 = vld [vmem:[%s999_s8 + $0x10] sm:$0x1]  ;;  %v229_v36 = vld [vmem:[%s999_s8 + $0xb] sm:$0x1]  ;;  %s653_s26 = sshll.u32 %s995_s22, 3 }
  0x40   : > { %v248_v28 = vmul.f32 0.25, %v240_v21  ;;  %v236_v30 = vmul.f32 %v228_v20, %v228_v20  ;;  %v258_v33 = vmul.f32 0.5, %v234_v17  ;;  %v221_v40 = vmul.f32 %v212_v27, %v212_v27  ;;  %v230_v45 = vld [vmem:[%s999_s8 + $0xd] sm:$0x1]  ;;  %v231_v50 = vld [vmem:[%s999_s8 + $0xf] sm:$0x1] }
  0x41   : > { %v1025_v32 = vadd.f32 %v257_v16, %v249_v24  ;;  %v244_v34 = vadd.f32 %v220_v26, %v219_v18  ;;  %v250_v38 = vmul.f32 0.25, %v242_v23  ;;  %v259_v41 = vmul.f32 0.5, %v235_v25  ;;  %v276_v2 = vld [vmem:[%s1006_s25 + $0x8] sm:$0x1]  ;;  %v277_v3 = vld [vmem:[%s1006_s25 + $0xa] sm:$0x1] }
  0x42   : > { %v1029_v37 = vadd.f32 %v256_v22, %v248_v28  ;;  %v260_v39 = vmul.f32 0.5, %v236_v30  ;;  %v222_v43 = vmul.f32 %v213_v31, %v213_v31  ;;  %v251_v44 = vmul.f32 0.25, %v243_v29  ;;  %v294_v6 = vld [vmem:[%s1006_s25 + $0x9] sm:$0x1]  ;;  %v278_v9 = vld [vmem:[%s1006_s25 + $0xc] sm:$0x1] }
  0x43   : > { %348 = vrot.lane.b32.xlu0 %v1025_v32, %s867_s19  ;;  %v252_v42 = vmul.f32 0.25, %v244_v34  ;;  %v223_v46 = vmul.f32 %v214_v35, %v214_v35  ;;  %v237_v47 = vmul.f32 %v229_v36, %v229_v36  ;;  %v245_v48 = vadd.f32 %v221_v40, %v220_v26  ;;  %v295_v13 = vld [vmem:[%s1006_s25 + $0xb] sm:$0x1]  ;;  %v273_v19 = vld [vmem:[%s1006_s25 + $0x2] sm:$0x1]  ;;  %s655_s27 = sshll.u32 %s904_s13, 3 }
  0x44   : > { %346 = vrot.lane.b32.xlu1 %v1029_v37, %s867_s19  ;;  %v1037_v51 = vadd.f32 %v258_v33, %v250_v38  ;;  %v238_v52 = vmul.f32 %v230_v45, %v230_v45  ;;  %v246_v53 = vadd.f32 %v222_v43, %v221_v40  ;;  %v1040_v56 = vadd.f32 %v259_v41, %v251_v44  ;;  %v274_v20 = vld [vmem:[%s1006_s25 + $0x4] sm:$0x1]  ;;  %v272_v23 = vld [vmem:[%s1006_s25] sm:$0x1]  ;;  %v291_v28 = vld [vmem:[%s1006_s25 + $0x3] sm:$0x1]  ;;  %s549_s14 = scalar_lea.hbm %s1217_s2, %s655_s27 }
  0x45   : > { %v268_v49 = vadd.f32 %v260_v39, %v252_v42  ;;  %v253_v54 = vmul.f32 0.25, %v245_v48  ;;  %v261_v55 = vmul.f32 0.5, %v237_v47  ;;  %v239_v57 = vmul.f32 %v231_v50, %v231_v50  ;;  %v290_v31 = vld [vmem:[%s1006_s25 + $0x1] sm:$0x1]  ;;  %v275_v41 = vld [vmem:[%s1006_s25 + $0x6] sm:$0x1] }
  0x46   : > { %v247_v58 = vadd.f32 %v223_v46, %v222_v43  ;;  %v254_v59 = vmul.f32 0.25, %v246_v53  ;;  %v262_v60 = vmul.f32 0.5, %v238_v52  ;;  %v285_v4 = vmul.f32 %v276_v2, %v276_v2  ;;  %v292_v50 = vld [vmem:[%s1006_s25 + $0x5] sm:$0x1]  ;;  %v293_v53 = vld [vmem:[%s1006_s25 + $0x7] sm:$0x1] }
  0x47   : > { %354 = vrot.lane.b32.xlu2 %v268_v49, %s867_s19  ;;  %v269_v61 = vadd.f32 %v261_v55, %v253_v54  ;;  %v263_v63 = vmul.f32 0.5, %v239_v57  ;;  %v286_v5 = vmul.f32 %v277_v3, %v277_v3  ;;  %v302_v7 = vmul.f32 %v294_v6, %v294_v6  ;;  %s205_s16 = scalar_lea.vmem [#allocation7], %s653_s26  ;;  %s553_s29 = sshll.u32 %s549_s14, 4  ;;  %s554_s29 = int_to_ptr.hbm [resolvable:$true] %s553_s29 }
  0x48   : > { %v255_v62 = vmul.f32 0.25, %v247_v58  ;;  %v1046_v0 = vadd.f32 %v262_v60, %v254_v59  ;;  %v1059_v12 = vmul.f32 %v278_v9, %v278_v9  ;;  %v303_v16 = vmul.f32 %v295_v13, %v295_v13  ;;  %v279_v58 = vld [vmem:[%s1006_s25 + $0xe] sm:$0x1]  ;;  %s551_s17 = sshll.u32 %s205_s16, 4  ;;  %s539_s3 = scalar_lea.sflag [#allocation4], %s995_s22  ;;  %s552_s17 = int_to_ptr.vmem [resolvable:$true] %s551_s17 }
  0x49   : > { %v310_v8 = vadd.f32 %v286_v5, %v285_v4  ;;  %v326_v11 = vmul.f32 0.5, %v302_v7  ;;  %v282_v26 = vmul.f32 %v273_v19, %v273_v19  ;;  %v283_v27 = vmul.f32 %v274_v20, %v274_v20  ;;  %v297_v19 = vld [vmem:[%s1006_s25 + $0xf] sm:$0x1]  ;;  %s807_s4 = sshra.s32 %s554_s29, 4  ;;  %s813_s24 = scalar_lea.hbm %s1217_s2, 16  ;;  %s808_s4 = int_to_ptr.hbm [resolvable:$true] %s807_s4 }
  0x4a   : > { %v1049_v1 = vadd.f32 %v263_v63, %v255_v62  ;;  %v311_v17 = vadd.f32 %v1059_v12, %v286_v5  ;;  %v327_v25 = vmul.f32 0.5, %v303_v16  ;;  %v281_v29 = vmul.f32 %v272_v23, %v272_v23  ;;  %v280_v62 = vld [vmem:[%s1006_s25 + $0x10] sm:$0x1]  ;;  %v296_v5 = vld [vmem:[%s1006_s25 + $0xd] sm:$0x1]  ;;  %s809_s30 = scalar_lea.hbm %s808_s4, 8  ;;  %p814_p2 = scmp.lt.s32.totalorder %s808_s4, %s1217_s2 }
  0x4b   : > { %350 = vrot.lane.b32.xlu0 %v1037_v51, %s867_s19  ;;  %v318_v10 = vmul.f32 0.25, %v310_v8  ;;  %v299_v36 = vmul.f32 %v291_v28, %v291_v28  ;;  %v307_v38 = vadd.f32 %v283_v27, %v282_v26  ;;  %v298_v39 = vmul.f32 %v290_v31, %v290_v31  ;;  %p810_p6 = scmp.ne.s32.totalorder %s808_s4, %s809_s30  ;;  %p815_p3 = scmp.lt.s32.totalorder %s813_s24, %s809_s30 }
  0x4c   : > { %352 = vrot.lane.b32.xlu1 %v1040_v56, %s867_s19  ;;  %v319_v24 = vmul.f32 0.25, %v311_v17  ;;  %v306_v40 = vadd.f32 %v282_v26, %v281_v29  ;;  %v284_v47 = vmul.f32 %v275_v41, %v275_v41  ;;  %v300_v55 = vmul.f32 %v292_v50, %v292_v50 }
  0x4d   : > { %v334_v14 = vadd.f32 %v326_v11, %v318_v10  ;;  %v315_v45 = vmul.f32 0.25, %v307_v38  ;;  %v323_v46 = vmul.f32 0.5, %v299_v36  ;;  %v301_v60 = vmul.f32 %v293_v53, %v293_v53  ;;  %p811_p13 = pnand %p810_p6, %p929_p11  ;;  %p816_p4 = por %p815_p3, %p814_p2 }
  0x4e   : > { %v335_v33 = vadd.f32 %v327_v25, %v319_v24  ;;  %v314_v48 = vmul.f32 0.25, %v306_v40  ;;  %v308_v57 = vadd.f32 %v284_v47, %v283_v27  ;;  %v288_v3 = vmul.f32 %v279_v58, %v279_v58 }
  0x4f   : > { %356 = vrot.lane.b32.xlu2 %v269_v61, %s867_s19  ;;  %v390_v21 = vmul.f32 0.5, %v334_v14  ;;  %v331_v54 = vadd.f32 %v323_v46, %v315_v45  ;;  %v324_v11 = vmul.f32 0.5, %v300_v55  ;;  %v325_v17 = vmul.f32 0.5, %v301_v60  ;;  %p812_p1 = pneg %p811_p13 }
  0x50   : > { %v391_v43 = vmul.f32 0.5, %v335_v33  ;;  %v316_v10 = vmul.f32 0.25, %v308_v57  ;;  %v305_v25 = vmul.f32 %v297_v19, %v297_v19  ;;  %vm515_vm5 = vcmask 1041409  }
  0x51   : > { %v387_v7 = vmul.f32 0.5, %v331_v54  ;;  %vm518_vm9 = vcmask 1042434   ;;  %vm521_vm10 = vcmask 1043459   ;;  %vm524_vm15 = vcmask 1044484   ;;  %p817_p5 = pnand %p816_p4, %p812_p1 }
  0x52   : > { %v332_v23 = vadd.f32 %v324_v11, %v316_v10 }
  0x53   : > { %358 = vrot.lane.b32.xlu0 %v1046_v0, %s867_s19 }
  0x54   : > { %360 = vrot.lane.b32.xlu1 %v1049_v1, %s867_s19 }
  0xa1   : > { %v355_v15 = vpop.permute.xlu2 %354 }
  0xa2   : > { %v374_v18 = vadd.f32 %v355_v15, %v268_v49  ;;  %v322_v49 = vmul.f32 0.5, %v298_v39  ;;  %v289_v15 = vmul.f32 %v280_v62, %v280_v62  ;;  %v329_v39 = vmul.f32 0.5, %v305_v25 }
  0xa4   : > { %v382_v22 = vmul.f32 0.25, %v374_v18  ;;  %v330_v59 = vadd.f32 %v322_v49, %v314_v48  ;;  %v304_v18 = vmul.f32 %v296_v5, %v296_v5  ;;  %v313_v26 = vadd.f32 %v289_v15, %v288_v3 }
  0xa6   : > { %v398_v30 = vadd.f32 %v390_v21, %v382_v22  ;;  %v386_v13 = vmul.f32 0.5, %v330_v59  ;;  %v328_v33 = vmul.f32 0.5, %v304_v18  ;;  %v321_v38 = vmul.f32 0.25, %v313_v26 }
  0xa8   : > { %v1069_v42 = vadd.f32 1e-12, %v398_v30  ;;  %v337_v49 = vadd.f32 %v329_v39, %v321_v38 }
  0xa9   : > { %v357_v34 = vpop.permute.xlu2 %356 }
  0xaa   : > { %v375_v35 = vadd.f32 %v357_v34, %v269_v61  ;;  %717 = vrsqrt.f32 %v1069_v42  ;;  %v309_v61 = vadd.f32 %v285_v4, %v284_v47  ;;  %v388_v34 = vmul.f32 0.5, %v332_v23 }
  0xab   : > { %vm465_vm0 = vcmp.eq.f32.partialorder %v1069_v42, inf  ;;  %vm467_vm1 = vcmp.eq.f32.partialorder %v1069_v42, 0.0  ;;  %v468_v26 = vand.u32 2147483648, %v1069_v42 }
  0xac   : > { %v383_v44 = vmul.f32 0.25, %v375_v35  ;;  %v317_v16 = vmul.f32 0.25, %v309_v61 }
  0xae   : > { %v399_v52 = vadd.f32 %v391_v43, %v383_v44  ;;  %v333_v27 = vadd.f32 %v325_v17, %v317_v16 }
  0xb0   : > { %v1076_v63 = vadd.f32 1e-12, %v399_v52  ;;  %v1079_v6 = vpop.eup %717  ;;  %v389_v40 = vmul.f32 0.5, %v333_v27 }
  0xb1   : > { %v459_v20 = vmul.f32 %v1079_v6, %v1069_v42 }
  0xb2   : > { %719 = vrsqrt.f32 %v1076_v63  ;;  %vm477_vm2 = vcmp.eq.f32.partialorder %v1076_v63, inf  ;;  %vm479_vm8 = vcmp.eq.f32.partialorder %v1076_v63, 0.0 }
  0xb3   : > { %v460_v28 = vmul.f32 %v1079_v6, %v459_v20 }
  0xb5   : > { %v349_v2 = vpop.permute.xlu0 %348  ;;  %v461_v43 = vmul.f32 0.5, %v460_v28 }
  0xb6   : > { %v371_v8 = vadd.f32 %v349_v2, %v1025_v32  ;;  %v347_v9 = vpop.permute.xlu1 %346  ;;  %v312_v32 = vadd.f32 %v288_v3, %v1059_v12  ;;  %v393_v3 = vmul.f32 0.5, %v337_v49 }
  0xb7   : > { %v370_v14 = vadd.f32 %v347_v9, %v1029_v37  ;;  %v462_v54 = vsub.f32 1.5, %v461_v43 }
  0xb8   : > { %v379_v4 = vmul.f32 0.25, %v371_v8  ;;  %v320_v31 = vmul.f32 0.25, %v312_v32  ;;  %v1094_v12 = vpop.eup %719 }
  0xb9   : > { %v378_v21 = vmul.f32 0.25, %v370_v14  ;;  %v471_v46 = vmul.f32 %v1094_v12, %v1076_v63  ;;  %v463_v10 = vmul.f32 %v1079_v6, %v462_v54 }
  0xba   : > { %v395_v22 = vadd.f32 %v387_v7, %v379_v4  ;;  %v336_v45 = vadd.f32 %v328_v33, %v320_v31 }
  0xbb   : > { %v394_v24 = vadd.f32 %v386_v13, %v378_v21  ;;  %v464_v20 = vmul.f32 %v463_v10, %v1069_v42 }
  0xbc   : > { %v1088_v37 = vadd.f32 1e-12, %v395_v22  ;;  %v392_v57 = vmul.f32 0.5, %v336_v45 }
  0xbd   : > { %v1091_v29 = vadd.f32 1e-12, %v394_v24  ;;  %v351_v30 = vpop.permute.xlu0 %350  ;;  %v466_v28 = vsel %vm465_vm0, %v1069_v42, %v464_v20 }
  0xbe   : > { %721 = vrsqrt.f32 %v1088_v37  ;;  %v353_v35 = vpop.permute.xlu1 %352  ;;  %v372_v36 = vadd.f32 %v351_v30, %v1037_v51  ;;  %v480_v30 = vand.u32 2147483648, %v1076_v63  ;;  %vm429_vm3 = vcmp.eq.f32.partialorder %v1088_v37, inf }
  0xbf   : > { %723 = vrsqrt.f32 %v1091_v29  ;;  %v373_v41 = vadd.f32 %v353_v35, %v1040_v56  ;;  %v472_v56 = vmul.f32 %v1094_v12, %v471_v46  ;;  %vm431_vm4 = vcmp.eq.f32.partialorder %v1088_v37, 0.0 }
  0xc0   : > { %v380_v44 = vmul.f32 0.25, %v372_v36  ;;  %v432_v35 = vand.u32 2147483648, %v1088_v37  ;;  %vm417_vm6 = vcmp.eq.f32.partialorder %v1091_v29, inf  ;;  %vm419_vm7 = vcmp.eq.f32.partialorder %v1091_v29, 0.0 }
  0xc1   : > { %v381_v47 = vmul.f32 0.25, %v373_v41  ;;  %v473_v15 = vmul.f32 0.5, %v472_v56 }
  0xc2   : > { %v396_v48 = vadd.f32 %v388_v34, %v380_v44  ;;  %v469_v44 = vsel %vm467_vm1, %v468_v26, %v466_v28  ;;  %vm527_vm1 = vcmask 1045509  }
  0xc3   : > { %v397_v52 = vadd.f32 %v389_v40, %v381_v47  ;;  %v474_v32 = vsub.f32 1.5, %v473_v15  ;;  %v420_v40 = vand.u32 2147483648, %v1091_v29 }
  0xc4   : > { %v722_v50 = vpop.eup %721  ;;  %v1102_v55 = vadd.f32 1e-12, %v396_v48 }
  0xc5   : > { %v724_v53 = vpop.eup %723  ;;  %v423_v51 = vmul.f32 %v722_v50, %v1088_v37  ;;  %v359_v58 = vpop.permute.xlu0 %358  ;;  %v1106_v60 = vadd.f32 1e-12, %v397_v52  ;;  %v475_v33 = vmul.f32 %v1094_v12, %v474_v32 }
  0xc6   : > { %v411_v59 = vmul.f32 %v724_v53, %v1091_v29  ;;  %v376_v61 = vadd.f32 %v359_v58, %v1046_v0  ;;  %v361_v62 = vpop.permute.xlu1 %360  ;;  %725 = vrsqrt.f32 %v1102_v55  ;;  %vm441_vm11 = vcmp.eq.f32.partialorder %v1102_v55, inf }
  0xc7   : > { %v424_v2 = vmul.f32 %v722_v50, %v423_v51  ;;  %727 = vrsqrt.f32 %v1106_v60  ;;  %v377_v8 = vadd.f32 %v361_v62, %v1049_v1  ;;  %v476_v48 = vmul.f32 %v475_v33, %v1076_v63 }
  0xc8   : > { %v412_v5 = vmul.f32 %v724_v53, %v411_v59  ;;  %v384_v7 = vmul.f32 0.25, %v376_v61  ;;  %v444_v42 = vand.u32 2147483648, %v1102_v55  ;;  %vm443_vm12 = vcmp.eq.f32.partialorder %v1102_v55, 0.0 }
  0xc9   : > { %v425_v9 = vmul.f32 0.5, %v424_v2  ;;  %v385_v14 = vmul.f32 0.25, %v377_v8  ;;  %vm453_vm13 = vcmp.eq.f32.partialorder %v1106_v60, inf  ;;  %vm455_vm14 = vcmp.eq.f32.partialorder %v1106_v60, 0.0 }
  0xca   : > { %v413_v11 = vmul.f32 0.5, %v412_v5  ;;  %v400_v13 = vadd.f32 %v392_v57, %v384_v7  ;;  %v456_v59 = vand.u32 2147483648, %v1106_v60 }
  0xcb   : > { %v426_v4 = vsub.f32 1.5, %v425_v9  ;;  %v401_v17 = vadd.f32 %v393_v3, %v385_v14  ;;  %v523_v14 = vrot.slane %v469_v44, 4 }
  0xcc   : > { %v414_v0 = vsub.f32 1.5, %v413_v11  ;;  %v1113_v16 = vadd.f32 1e-12, %v400_v13  ;;  %v726_v18 = vpop.eup %725 }
  0xcd   : > { %v427_v19 = vmul.f32 %v722_v50, %v426_v4  ;;  %v728_v21 = vpop.eup %727  ;;  %v435_v1 = vmul.f32 %v726_v18, %v1102_v55  ;;  %v1119_v6 = vadd.f32 1e-12, %v401_v17 }
  0xce   : > { %729 = vrsqrt.f32 %v1113_v16  ;;  %v447_v23 = vmul.f32 %v728_v21, %v1106_v60  ;;  %v415_v24 = vmul.f32 %v724_v53, %v414_v0  ;;  %vm489_vm0 = vcmp.eq.f32.partialorder %v1113_v16, inf }
  0xcf   : > { %v428_v22 = vmul.f32 %v427_v19, %v1088_v37  ;;  %v436_v25 = vmul.f32 %v726_v18, %v435_v1  ;;  %731 = vrsqrt.f32 %v1119_v6  ;;  %v492_v17 = vand.u32 2147483648, %v1113_v16 }
  0xd0   : > { %v448_v27 = vmul.f32 %v728_v21, %v447_v23  ;;  %v416_v39 = vmul.f32 %v415_v24, %v1091_v29 }
  0xd1   : > { %v437_v31 = vmul.f32 0.5, %v436_v25  ;;  %v430_v34 = vsel %vm429_vm3, %v1088_v37, %v428_v22  ;;  %vm491_vm3 = vcmp.eq.f32.partialorder %v1113_v16, 0.0 }
  0xd2   : > { %v449_v36 = vmul.f32 0.5, %v448_v27  ;;  %v433_v47 = vsel %vm431_vm4, %v432_v35, %v430_v34  ;;  %v418_v54 = vsel %vm417_vm6, %v1091_v29, %v416_v39  ;;  %vm501_vm4 = vcmp.eq.f32.partialorder %v1119_v6, inf }
  0xd3   : > { %v438_v41 = vsub.f32 1.5, %v437_v31  ;;  %v514_v58 = vrot.slane %v433_v47, 7  ;;  %v421_v5 = vsel %vm419_vm7, %v420_v40, %v418_v54  ;;  %vm533_vm6 = vcmask 1047559  }
  0xd4   : > { %v730_v38 = vpop.eup %729  ;;  %v450_v43 = vsub.f32 1.5, %v449_v36  ;;  %vm536_vm7 = vcmask 261120  }
  0xd5   : > { %v483_v12 = vmul.f32 %v730_v38, %v1113_v16  ;;  %v732_v45 = vpop.eup %731  ;;  %v439_v46 = vmul.f32 %v726_v18, %v438_v41  ;;  %v516_v11 = vsel %vm515_vm5, %v514_v58, %v421_v5  ;;  %vm503_vm5 = vcmp.eq.f32.partialorder %v1119_v6, 0.0 }
  0xd6   : > { %v451_v49 = vmul.f32 %v728_v21, %v450_v43  ;;  %v495_v50 = vmul.f32 %v732_v45, %v1119_v6  ;;  %v504_v21 = vand.u32 2147483648, %v1119_v6 }
  0xd7   : > { %v484_v52 = vmul.f32 %v730_v38, %v483_v12  ;;  %v440_v53 = vmul.f32 %v439_v46, %v1102_v55 }
  0xd8   : > { %v452_v37 = vmul.f32 %v451_v49, %v1106_v60  ;;  %v496_v57 = vmul.f32 %v732_v45, %v495_v50 }
  0xd9   : > { %v485_v51 = vmul.f32 0.5, %v484_v52  ;;  %v442_v56 = vsel %vm441_vm11, %v1102_v55, %v440_v53  ;;  %v478_v55 = vsel %vm477_vm2, %v1076_v63, %v476_v48  ;;  %vm530_vm2 = vcmask 1046534  }
  0xda   : > { %v445_v61 = vsel %vm443_vm12, %v444_v42, %v442_v56  ;;  %v454_v62 = vsel %vm453_vm13, %v1106_v60, %v452_v37  ;;  %v497_v3 = vmul.f32 0.5, %v496_v57  ;;  %v481_v29 = vsel %vm479_vm8, %v480_v30, %v478_v55 }
  0xdb   : > { %v486_v2 = vsub.f32 1.5, %v485_v51  ;;  %v457_v7 = vsel %vm455_vm14, %v456_v59, %v454_v62  ;;  %v517_v8 = vrot.slane %v445_v61, 6  ;;  %v526_v1 = vrot.slane %v481_v29, 3 }
  0xdc   : > { %v498_v10 = vsub.f32 1.5, %v497_v3  ;;  %v520_v13 = vrot.slane %v457_v7, 5 }
  0xdd   : > { %v487_v9 = vmul.f32 %v730_v38, %v486_v2  ;;  %v519_v60 = vsel %vm518_vm9, %v517_v8, %v516_v11 }
  0xde   : > { %v499_v4 = vmul.f32 %v732_v45, %v498_v10  ;;  %v522_v0 = vsel %vm521_vm10, %v520_v13, %v519_v60 }
  0xdf   : > { %v488_v15 = vmul.f32 %v487_v9, %v1113_v16  ;;  %v525_v19 = vsel %vm524_vm15, %v523_v14, %v522_v0 }
  0xe0   : > { %v500_v63 = vmul.f32 %v499_v4, %v1119_v6  ;;  %v528_v23 = vsel %vm527_vm1, %v526_v1, %v525_v19 }
  0xe1   : > { %v490_v18 = vsel %vm489_vm0, %v1113_v16, %v488_v15 }
  0xe2   : > { %v493_v20 = vsel %vm491_vm3, %v492_v17, %v490_v18  ;;  %v502_v32 = vsel %vm501_vm4, %v1119_v6, %v500_v63 }
  0xe3   : > { %v529_v22 = vrot.slane %v493_v20, 2  ;;  %v505_v16 = vsel %vm503_vm5, %v504_v21, %v502_v32 }
  0xe4   : > { %v532_v25 = vrot.slane %v505_v16, 1 }
  0xe5   : > { %v531_v24 = vsel %vm530_vm2, %v529_v22, %v528_v23 }
  0xe6   : > { %v534_v26 = vsel %vm533_vm6, %v532_v25, %v531_v24 }
  0xe7   : > { %537 = vst.msk [vmem:[%s205_s16] sm:$0xff] %vm536_vm7, %v534_v26 }
  0xe8   : > { %820 = shalt.err (!%p817_p5)
}
  0xe9   : > { %667 = dma.vmem_to_hbm [thread:$0]  (%p929_p11), %s552_s17, 128, %s554_s29, %s539_s3  }
  0xea PF: > { %s565_s22 = sand.u32 1, %s851_s9   ;;  %p677_p7 = pnand %p649_p9, %p933_p12 }
  0xeb   : > { %s566_s28 = scalar_lea.sflag [#allocation4], %s565_s22 }
  0xec   : > { %p678_p8 = pneg %p677_p7 }
  0xee   : > { %846 = dma.done.wait (%p678_p8), %s566_s28, 128  }
  0xef   : > { %848 = vsyncadd (%p678_p8), %s566_s28, 4294967168  ;;  %p18_p10 = scmp.ge.s32.totalorder %s908_s15, 4   ;;  %s1223_s9 = smov %s855_s10 }
  0xf0   : > { %s1224_s10 = smov %s859_s11  ;;  %s1225_s11 = smov %s920_s18 }
  0xf1   : > { %s1226_s12 = smov %s908_s15  ;;  %20 = sbr.rel (!%p18_p10) target bundleno = 7 (0x7), region = 86 }
  0xf6   :  { %572 = vsyncpa [#allocation3], 1 }
  0xf7   :  { %574 = vsyncpa [#allocation3 + $0x1], 1 }
  0xf8   :  { %575 = vsyncpa [#allocation6], 1 }
  0xf9   :  { %577 = vsyncpa [#allocation6 + $0x1], 1 }
  0xfa   :  { %578 = vsyncpa [#allocation4], 1 }
  0xfb   :  { %580 = vsyncpa [#allocation4 + $0x1], 1 }

</bundles_post_ra>
